<compile_context>
chip_gen: v5e
topology: v5e:2x2
jax: 0.10.0
libtpu: 0.0.40
codegen_flags: <defaults>
</compile_context>

<pallas_src>
import jax
import jax.numpy as jnp
from jax.experimental import pallas as pl
from jax.experimental.pallas import tpu as pltpu

D = 128          # hidden_dim (module default)
BN_EPS = 1e-5
LRELU_SLOPE = 0.01


def _bn_lrelu_per_modality(h_flat, M, B):
    # BatchNorm1d in (fresh-init) training mode: per-modality batch mean and
    # biased batch var, gamma=1, beta=0 (as set by _initialize_weights),
    # followed by LeakyReLU(0.01).
    # One-pass stats: the two sublane reductions (s1, s2) are independent so
    # they can overlap each other and the previous matmul's result pop.
    # TODO(synk): for a trained model in eval mode, running_mean/var and the
    # learned affine params should be passed as kernel inputs instead.
    h = h_flat.reshape(M, B, h_flat.shape[-1])
    inv_b = 1.0 / B
    s1 = jnp.sum(h, axis=1, keepdims=True)
    s2 = jnp.sum(h * h, axis=1, keepdims=True)
    mu = s1 * inv_b
    var = s2 * inv_b - mu * mu
    hn = (h - mu) * jax.lax.rsqrt(var + BN_EPS)
    hn = jnp.maximum(hn, LRELU_SLOPE * hn)
    return hn.reshape(M * B, h_flat.shape[-1])


def dualnet_kernel(ft_ref, flag_ref,
                   wstack_ref,                      # [5, D, D]: reduce, aspp, out, comp_shared, comp_spec
                   wcls_ref, bcls_ref,              # cls_classifier (bias in SMEM)
                   logits_ref, shared_ref, fused_ref):
    M, B, Dd = ft_ref.shape

    # flag masking for all modalities at once:  ft * flag.unsqueeze(-1)
    x = (ft_ref[...] * flag_ref[...]).reshape(M * B, Dd)               # [M*B, D]

    # x-only half of the compositional matmul. Independent of the encoder
    # chain, so the scheduler can hide its MXU fill/drain under it.
    comp_x = jnp.dot(x, wstack_ref[4], preferred_element_type=jnp.float32)

    # MIMICEncoder (shared weights across modalities): batched matmuls over all
    # M*B rows, per-modality BN stats inside _bn_lrelu_per_modality.
    g = _bn_lrelu_per_modality(
        jnp.dot(x, wstack_ref[0], preferred_element_type=jnp.float32), M, B)
    a = _bn_lrelu_per_modality(
        jnp.dot(g, wstack_ref[1], preferred_element_type=jnp.float32), M, B)
    shared = jnp.dot(a, wstack_ref[2], preferred_element_type=jnp.float32)  # [M*B, D]

    # CompositionalLayer:  out = cat([shared, spec]) @ W_compos^T split into
    # two K=D matmuls; fused = shared + out.
    comp_sh = jnp.dot(shared, wstack_ref[3], preferred_element_type=jnp.float32)
    fused = shared + comp_sh + comp_x                                  # [M*B, D]

    shared3 = shared.reshape(M, B, Dd)
    fused3 = fused.reshape(M, B, Dd)
    shared_ref[...] = shared3.astype(shared_ref.dtype)
    fused_ref[...] = fused3.astype(fused_ref.dtype)

    # cls_classifier on the modality mean: broadcast-mul + lane reduction
    # (cheaper than an N=1 matmul).
    fused_all = jnp.mean(fused3, axis=0)                               # [B, D]
    logits = (jnp.sum(fused_all * wcls_ref[...], axis=-1, keepdims=True)
              + bcls_ref[0])
    logits_ref[...] = logits.astype(logits_ref.dtype)


@jax.jit
def dualnet_ss_forward(ft_stack, flag_stack, w_stack, wcls_row, bcls):
    """ft_stack: [3, B, D] f32, flag_stack: [3, B, 1] f32,
    w_stack: [5, D, D] f32, wcls_row: [1, D] f32, bcls: [1] f32."""
    M, B, _ = ft_stack.shape
    vmem = pl.BlockSpec(memory_space=pltpu.MemorySpace.VMEM)
    smem = pl.BlockSpec(memory_space=pltpu.MemorySpace.SMEM)

    return pl.pallas_call(
        dualnet_kernel,
        out_shape=(
            jax.ShapeDtypeStruct((B, 1), jnp.float32),     # logits
            jax.ShapeDtypeStruct((M, B, D), jnp.float32),  # shared_feats
            jax.ShapeDtypeStruct((M, B, D), jnp.float32),  # spec_feats (fused)
        ),
        in_specs=[vmem, vmem, vmem, vmem, smem],
        out_specs=(vmem, vmem, vmem),
    )(ft_stack, flag_stack, w_stack, wcls_row, bcls)


def reference_forward(ft_stack, flag_stack, wr_t, wa_t, wo_t, wcomp_t,
                      wcls_row, bcls):
    # pure-JAX reference of the same math, per modality (two-pass BN stats)
    def bn_lrelu(h):
        mu = jnp.mean(h, axis=0, keepdims=True)
        var = jnp.mean((h - mu) * (h - mu), axis=0, keepdims=True)
        hn = (h - mu) * jax.lax.rsqrt(var + BN_EPS)
        return jnp.where(hn >= 0, hn, LRELU_SLOPE * hn)

    shareds, fuseds = [], []
    for m in range(ft_stack.shape[0]):
        x = ft_stack[m] * flag_stack[m]
        g = bn_lrelu(x @ wr_t)
        a = bn_lrelu(g @ wa_t)
        sh = a @ wo_t
        fu = sh + jnp.concatenate([sh, x], axis=-1) @ wcomp_t
        shareds.append(sh)
        fuseds.append(fu)
    fused_all = (fuseds[0] + fuseds[1] + fuseds[2]) / 3.0
    logits = jnp.sum(fused_all * wcls_row, axis=-1, keepdims=True) + bcls[0]
    return logits, jnp.stack(shareds), jnp.stack(fuseds)


if __name__ == "__main__":
    B = 8
    key = jax.random.PRNGKey(0)
    keys = jax.random.split(key, 12)

    # Modality features (stand-ins for text_enc / code_enc / lab_enc outputs).
    # TODO(synk): TextEncoder/CodeEncoder/RNNEncoder are external modules not
    # provided with DualNet_SS; their outputs are taken as inputs here.
    text_ft = jax.random.normal(keys[0], (B, D), jnp.float32)
    code_ft = jax.random.normal(keys[1], (B, D), jnp.float32)
    lab_ft = jax.random.normal(keys[2], (B, D), jnp.float32)
    ft_stack = jnp.stack([text_ft, code_ft, lab_ft])                 # [3, B, D]

    discharge_flag = (jax.random.uniform(keys[3], (B,)) > 0.3).astype(jnp.float32)
    codes_flag = (jax.random.uniform(keys[4], (B,)) > 0.3).astype(jnp.float32)
    lab_flag = (jax.random.uniform(keys[5], (B,)) > 0.3).astype(jnp.float32)
    flag_stack = jnp.stack([discharge_flag, codes_flag, lab_flag])[..., None]  # [3, B, 1]

    # Deterministic parameter init (shapes follow the module __init__).
    kaiming_std = (2.0 / D) ** 0.5     # kaiming_normal_, mode='fan_out', fan_out=D
    w_reduce = kaiming_std * jax.random.normal(keys[6], (D, D), jnp.float32)   # [out, in]
    w_aspp = kaiming_std * jax.random.normal(keys[7], (D, D), jnp.float32)
    w_out = kaiming_std * jax.random.normal(keys[8], (D, D), jnp.float32)
    w_compos = 0.05 * jax.random.normal(keys[9], (D, 2 * D), jnp.float32)      # Linear(2D -> D)
    w_cls = 0.05 * jax.random.normal(keys[10], (1, D), jnp.float32)            # Linear(D -> 1)
    b_cls = 0.05 * jax.random.normal(keys[11], (1,), jnp.float32)

    # Pre-transpose weights to [in, out]. cat order in the reference is
    # [shared, spec] (matching torch.cat([shared_ft, spec_ft], dim=-1)), so
    # wcomp_t[:D] is the shared-half and wcomp_t[D:] is the spec(x)-half.
    wr_t = w_reduce.T
    wa_t = w_aspp.T
    wo_t = w_out.T
    wcomp_t = w_compos.T          # [2D, D]
    wcls_row = w_cls              # [1, D], used via broadcast + lane reduction

    # Stack all five DxD weights into one contiguous input -> single DMA.
    w_stack = jnp.stack([wr_t, wa_t, wo_t, wcomp_t[:D], wcomp_t[D:]])  # [5, D, D]

    logits, shared_feats, spec_feats = dualnet_ss_forward(
        ft_stack, flag_stack, w_stack, wcls_row, b_cls)
    jax.block_until_ready((logits, shared_feats, spec_feats))

    ref_logits, ref_shared, ref_spec = reference_forward(
        ft_stack, flag_stack, wr_t, wa_t, wo_t, wcomp_t, wcls_row, b_cls)

    assert logits.shape == (B, 1)
    assert shared_feats.shape == (3, B, D) and spec_feats.shape == (3, B, D)
    assert jnp.allclose(logits, ref_logits, atol=2e-4, rtol=2e-4)
    assert jnp.allclose(shared_feats, ref_shared, atol=2e-4, rtol=2e-4)
    assert jnp.allclose(spec_feats, ref_spec, atol=2e-4, rtol=2e-4)

    print("KERNEL_OK")
</pallas_src>

<mosaic_0001>
module attributes {stable_mosaic.version = 11 : i64} {
  func.func @dualnet_kernel(%arg0: memref<3x8x128xf32, #tpu.memory_space<vmem>>, %arg1: memref<3x8x1xf32, #tpu.memory_space<vmem>>, %arg2: memref<5x128x128xf32, #tpu.memory_space<vmem>>, %arg3: memref<1x128xf32, #tpu.memory_space<vmem>>, %arg4: memref<1xf32, #tpu.memory_space<smem>>, %arg5: memref<8x1xf32, #tpu.memory_space<vmem>>, %arg6: memref<3x8x128xf32, #tpu.memory_space<vmem>>, %arg7: memref<3x8x128xf32, #tpu.memory_space<vmem>>) attributes {dimension_semantics = [], scalar_prefetch = 0 : i64, scratch_operands = 0 : i64, tpu.core_type = #tpu.core_type<tc>} {
    %c0 = arith.constant 0 : index
    %c0_0 = arith.constant 0 : index
    %c0_1 = arith.constant 0 : index
    %0 = vector.load %arg0[%c0, %c0_0, %c0_1] : memref<3x8x128xf32, #tpu.memory_space<vmem>>, vector<3x8x128xf32>
    %c0_2 = arith.constant 0 : index
    %c0_3 = arith.constant 0 : index
    %c0_4 = arith.constant 0 : index
    %1 = vector.load %arg1[%c0_2, %c0_3, %c0_4] : memref<3x8x1xf32, #tpu.memory_space<vmem>>, vector<3x8x1xf32>
    %2 = vector.broadcast %1 : vector<3x8x1xf32> to vector<3x8x128xf32>
    %3 = arith.mulf %0, %2 : vector<3x8x128xf32>
    %4 = vector.shape_cast %3 : vector<3x8x128xf32> to vector<24x128xf32>
    %c4 = arith.constant 4 : index
    %c0_5 = arith.constant 0 : index
    %c0_6 = arith.constant 0 : index
    %5 = vector.load %arg2[%c4, %c0_5, %c0_6] : memref<5x128x128xf32, #tpu.memory_space<vmem>>, vector<1x128x128xf32>
    %6 = vector.shape_cast %5 : vector<1x128x128xf32> to vector<128x128xf32>
    %cst = arith.constant dense<0.000000e+00> : vector<24x128xf32>
    %7 = tpu.matmul %4, %6, %cst {dimension_numbers = #tpu.dot_dimension_numbers<[1], [0], [0], [1], [0, 0, 1, 1], [], []>} : vector<24x128xf32>, vector<128x128xf32>, vector<24x128xf32> -> vector<24x128xf32>
    %c0_7 = arith.constant 0 : index
    %c0_8 = arith.constant 0 : index
    %c0_9 = arith.constant 0 : index
    %8 = vector.load %arg2[%c0_7, %c0_8, %c0_9] : memref<5x128x128xf32, #tpu.memory_space<vmem>>, vector<1x128x128xf32>
    %9 = vector.shape_cast %8 : vector<1x128x128xf32> to vector<128x128xf32>
    %cst_10 = arith.constant dense<0.000000e+00> : vector<24x128xf32>
    %10 = tpu.matmul %4, %9, %cst_10 {dimension_numbers = #tpu.dot_dimension_numbers<[1], [0], [0], [1], [0, 0, 1, 1], [], []>} : vector<24x128xf32>, vector<128x128xf32>, vector<24x128xf32> -> vector<24x128xf32>
    %11 = vector.shape_cast %10 : vector<24x128xf32> to vector<3x8x128xf32>
    %cst_11 = arith.constant dense<0.000000e+00> : vector<3x128xf32>
    %12 = vector.multi_reduction <add>, %11, %cst_11 [1] : vector<3x8x128xf32> to vector<3x128xf32>
    %13 = vector.shape_cast %12 : vector<3x128xf32> to vector<3x1x128xf32>
    %14 = arith.mulf %11, %11 : vector<3x8x128xf32>
    %cst_12 = arith.constant dense<0.000000e+00> : vector<3x128xf32>
    %15 = vector.multi_reduction <add>, %14, %cst_12 [1] : vector<3x8x128xf32> to vector<3x128xf32>
    %16 = vector.shape_cast %15 : vector<3x128xf32> to vector<3x1x128xf32>
    %cst_13 = arith.constant 1.250000e-01 : f32
    %17 = vector.broadcast %cst_13 : f32 to vector<3x1x128xf32>
    %18 = arith.mulf %13, %17 : vector<3x1x128xf32>
    %cst_14 = arith.constant 1.250000e-01 : f32
    %19 = vector.broadcast %cst_14 : f32 to vector<3x1x128xf32>
    %20 = arith.mulf %16, %19 : vector<3x1x128xf32>
    %21 = arith.mulf %18, %18 : vector<3x1x128xf32>
    %22 = arith.subf %20, %21 : vector<3x1x128xf32>
    %23 = vector.broadcast %18 : vector<3x1x128xf32> to vector<3x8x128xf32>
    %24 = arith.subf %11, %23 : vector<3x8x128xf32>
    %cst_15 = arith.constant 9.99999974E-6 : f32
    %25 = vector.broadcast %cst_15 : f32 to vector<3x1x128xf32>
    %26 = arith.addf %22, %25 : vector<3x1x128xf32>
    %27 = math.rsqrt %26 : vector<3x1x128xf32>
    %28 = vector.broadcast %27 : vector<3x1x128xf32> to vector<3x8x128xf32>
    %29 = arith.mulf %24, %28 : vector<3x8x128xf32>
    %cst_16 = arith.constant 0.00999999977 : f32
    %30 = vector.broadcast %cst_16 : f32 to vector<3x8x128xf32>
    %31 = arith.mulf %30, %29 : vector<3x8x128xf32>
    %32 = arith.maximumf %29, %31 : vector<3x8x128xf32>
    %33 = vector.shape_cast %32 : vector<3x8x128xf32> to vector<24x128xf32>
    %c1 = arith.constant 1 : index
    %c0_17 = arith.constant 0 : index
    %c0_18 = arith.constant 0 : index
    %34 = vector.load %arg2[%c1, %c0_17, %c0_18] : memref<5x128x128xf32, #tpu.memory_space<vmem>>, vector<1x128x128xf32>
    %35 = vector.shape_cast %34 : vector<1x128x128xf32> to vector<128x128xf32>
    %cst_19 = arith.constant dense<0.000000e+00> : vector<24x128xf32>
    %36 = tpu.matmul %33, %35, %cst_19 {dimension_numbers = #tpu.dot_dimension_numbers<[1], [0], [0], [1], [0, 0, 1, 1], [], []>} : vector<24x128xf32>, vector<128x128xf32>, vector<24x128xf32> -> vector<24x128xf32>
    %37 = vector.shape_cast %36 : vector<24x128xf32> to vector<3x8x128xf32>
    %cst_20 = arith.constant dense<0.000000e+00> : vector<3x128xf32>
    %38 = vector.multi_reduction <add>, %37, %cst_20 [1] : vector<3x8x128xf32> to vector<3x128xf32>
    %39 = vector.shape_cast %38 : vector<3x128xf32> to vector<3x1x128xf32>
    %40 = arith.mulf %37, %37 : vector<3x8x128xf32>
    %cst_21 = arith.constant dense<0.000000e+00> : vector<3x128xf32>
    %41 = vector.multi_reduction <add>, %40, %cst_21 [1] : vector<3x8x128xf32> to vector<3x128xf32>
    %42 = vector.shape_cast %41 : vector<3x128xf32> to vector<3x1x128xf32>
    %cst_22 = arith.constant 1.250000e-01 : f32
    %43 = vector.broadcast %cst_22 : f32 to vector<3x1x128xf32>
    %44 = arith.mulf %39, %43 : vector<3x1x128xf32>
    %cst_23 = arith.constant 1.250000e-01 : f32
    %45 = vector.broadcast %cst_23 : f32 to vector<3x1x128xf32>
    %46 = arith.mulf %42, %45 : vector<3x1x128xf32>
    %47 = arith.mulf %44, %44 : vector<3x1x128xf32>
    %48 = arith.subf %46, %47 : vector<3x1x128xf32>
    %49 = vector.broadcast %44 : vector<3x1x128xf32> to vector<3x8x128xf32>
    %50 = arith.subf %37, %49 : vector<3x8x128xf32>
    %cst_24 = arith.constant 9.99999974E-6 : f32
    %51 = vector.broadcast %cst_24 : f32 to vector<3x1x128xf32>
    %52 = arith.addf %48, %51 : vector<3x1x128xf32>
    %53 = math.rsqrt %52 : vector<3x1x128xf32>
    %54 = vector.broadcast %53 : vector<3x1x128xf32> to vector<3x8x128xf32>
    %55 = arith.mulf %50, %54 : vector<3x8x128xf32>
    %cst_25 = arith.constant 0.00999999977 : f32
    %56 = vector.broadcast %cst_25 : f32 to vector<3x8x128xf32>
    %57 = arith.mulf %56, %55 : vector<3x8x128xf32>
    %58 = arith.maximumf %55, %57 : vector<3x8x128xf32>
    %59 = vector.shape_cast %58 : vector<3x8x128xf32> to vector<24x128xf32>
    %c2 = arith.constant 2 : index
    %c0_26 = arith.constant 0 : index
    %c0_27 = arith.constant 0 : index
    %60 = vector.load %arg2[%c2, %c0_26, %c0_27] : memref<5x128x128xf32, #tpu.memory_space<vmem>>, vector<1x128x128xf32>
    %61 = vector.shape_cast %60 : vector<1x128x128xf32> to vector<128x128xf32>
    %cst_28 = arith.constant dense<0.000000e+00> : vector<24x128xf32>
    %62 = tpu.matmul %59, %61, %cst_28 {dimension_numbers = #tpu.dot_dimension_numbers<[1], [0], [0], [1], [0, 0, 1, 1], [], []>} : vector<24x128xf32>, vector<128x128xf32>, vector<24x128xf32> -> vector<24x128xf32>
    %c3 = arith.constant 3 : index
    %c0_29 = arith.constant 0 : index
    %c0_30 = arith.constant 0 : index
    %63 = vector.load %arg2[%c3, %c0_29, %c0_30] : memref<5x128x128xf32, #tpu.memory_space<vmem>>, vector<1x128x128xf32>
    %64 = vector.shape_cast %63 : vector<1x128x128xf32> to vector<128x128xf32>
    %cst_31 = arith.constant dense<0.000000e+00> : vector<24x128xf32>
    %65 = tpu.matmul %62, %64, %cst_31 {dimension_numbers = #tpu.dot_dimension_numbers<[1], [0], [0], [1], [0, 0, 1, 1], [], []>} : vector<24x128xf32>, vector<128x128xf32>, vector<24x128xf32> -> vector<24x128xf32>
    %66 = arith.addf %62, %65 : vector<24x128xf32>
    %67 = arith.addf %66, %7 : vector<24x128xf32>
    %68 = vector.shape_cast %62 : vector<24x128xf32> to vector<3x8x128xf32>
    %69 = vector.shape_cast %67 : vector<24x128xf32> to vector<3x8x128xf32>
    %c0_32 = arith.constant 0 : index
    %c0_33 = arith.constant 0 : index
    %c0_34 = arith.constant 0 : index
    %70 = vector.load %arg6[%c0_32, %c0_33, %c0_34] : memref<3x8x128xf32, #tpu.memory_space<vmem>>, vector<3x8x128xf32>
    tpu.vector_store %arg6[%c0_32, %c0_33, %c0_34], %68 {strides = array<i32>} : memref<3x8x128xf32, #tpu.memory_space<vmem>>, vector<3x8x128xf32>,
    %c0_35 = arith.constant 0 : index
    %c0_36 = arith.constant 0 : index
    %c0_37 = arith.constant 0 : index
    %71 = vector.load %arg7[%c0_35, %c0_36, %c0_37] : memref<3x8x128xf32, #tpu.memory_space<vmem>>, vector<3x8x128xf32>
    tpu.vector_store %arg7[%c0_35, %c0_36, %c0_37], %69 {strides = array<i32>} : memref<3x8x128xf32, #tpu.memory_space<vmem>>, vector<3x8x128xf32>,
    %cst_38 = arith.constant dense<0.000000e+00> : vector<8x128xf32>
    %72 = vector.multi_reduction <add>, %69, %cst_38 [0] : vector<3x8x128xf32> to vector<8x128xf32>
    %cst_39 = arith.constant 3.000000e+00 : f32
    %73 = vector.broadcast %cst_39 : f32 to vector<8x128xf32>
    %74 = arith.divf %72, %73 : vector<8x128xf32>
    %c0_40 = arith.constant 0 : index
    %c0_41 = arith.constant 0 : index
    %75 = vector.load %arg3[%c0_40, %c0_41] : memref<1x128xf32, #tpu.memory_space<vmem>>, vector<1x128xf32>
    %76 = vector.broadcast %75 : vector<1x128xf32> to vector<8x128xf32>
    %77 = arith.mulf %74, %76 : vector<8x128xf32>
    %cst_42 = arith.constant dense<0.000000e+00> : vector<8xf32>
    %78 = vector.multi_reduction <add>, %77, %cst_42 [1] : vector<8x128xf32> to vector<8xf32>
    %79 = vector.shape_cast %78 : vector<8xf32> to vector<8x1xf32>
    %c0_43 = arith.constant 0 : index
    %80 = memref.load %arg4[%c0_43] : memref<1xf32, #tpu.memory_space<smem>>
    %81 = vector.broadcast %80 : f32 to vector<8x1xf32>
    %82 = arith.addf %79, %81 : vector<8x1xf32>
    %c0_44 = arith.constant 0 : index
    %c0_45 = arith.constant 0 : index
    %83 = vector.load %arg5[%c0_44, %c0_45] : memref<8x1xf32, #tpu.memory_space<vmem>>, vector<8x1xf32>
    tpu.vector_store %arg5[%c0_44, %c0_45], %82 {strides = array<i32>} : memref<8x1xf32, #tpu.memory_space<vmem>>, vector<8x1xf32>,
    return
  }
}

</mosaic_0001>

<bundles_post_ra>
// kernel: dualnet_ss_forward.1
= control target key start
LH: loop header
LB: loop body
LE: loop exit
PB: predicated region body
PF: predicated region fallthrough
CT: control target
= control target key end

     0   :  { %14 = vsyncpa [#allocation4], 0  ;;  %s840_s0 = inlined_call_operand.vmem [shape: f32[3,8,128], index: 0, kind: input, shape index: {}]   ;;  %s841_s1 = inlined_call_operand.vmem [shape: f32[3,8,1], index: 1, kind: input, shape index: {}]   ;;  %s842_s2 = inlined_call_operand.hbm [shape: f32[5,128,128], index: 2, kind: input, shape index: {}]   ;;  %s843_s3 = inlined_call_operand.vmem [shape: f32[1,128], index: 3, kind: input, shape index: {}]   ;;  %s844_s4 = inlined_call_operand.<no memory space> [shape: f32[1], index: 4, kind: input, shape index: {}]   ;;  %s845_s5 = inlined_call_operand.vmem [shape: f32[8,1], index: 5, kind: output, shape index: {0}]   ;;  %s846_s6 = inlined_call_operand.hbm [shape: f32[3,8,128], index: 6, kind: output, shape index: {1}]   ;;  %s847_s7 = inlined_call_operand.hbm [shape: f32[3,8,128], index: 7, kind: output, shape index: {2}]  }
   0x1   :  { %15 = vsyncpa [#allocation5], 0 }
   0x2   :  { %16 = vsyncpa [#allocation8], 0  ;;  %s25_s26 = sshll.u32 %s842_s2, 4  ;;  %s681_s27 = smov [#allocation3]   ;;  %s26_s26 = int_to_ptr.hbm [resolvable:$true] %s25_s26 }
   0x3   :  { %s27_s28 = sshll.u32 %s681_s27, 4  ;;  %s682_s29 = smov 128   ;;  %s28_s28 = int_to_ptr.vmem [resolvable:$true] %s27_s28 }
   0x4   :  { %s683_s30 = smov 8  }
   0x5   :  { %33 = dma.hbm_to_vmem [thread:$0]  %s26_s26, 10240, %s28_s28, [#allocation4], %s682_s29, %s682_s29, %s683_s30  }
   0x6   :  { %675 = dma.done.wait [#allocation4], 10240  }
   0x7   :  { %676 = vsyncadd [#allocation4], 4294957056  ;;  %v684_v0 = vmov 0   ;;  %v45_v1 = vld [vmem:[%s841_s1] sm:$0xff]  ;;  %v47_v2 = vld [vmem:[%s841_s1 + $0x10] sm:$0xff]  ;;  %s514_s21 = sshll.u32 %s846_s6, 4  ;;  %s515_s21 = int_to_ptr.hbm [resolvable:$true] %s514_s21 }
   0x8   :  { %586 = vset.pattern.permute.xlu0 %v684_v0  ;;  %587 = vset.pattern.permute.xlu1 %v684_v0  ;;  %v82_v3 = vld [vmem:[#allocation3 + $0x278] sm:$0xff]  ;;  %v81_v5 = vld [vmem:[#allocation3 + $0x270] sm:$0xff]  ;;  %v80_v7 = vld [vmem:[#allocation3 + $0x268] sm:$0xff]  ;;  %s687_s22 = smov [#allocation7]   ;;  %s527_s26 = sshll.u32 %s847_s7, 4  ;;  %s528_s26 = int_to_ptr.hbm [resolvable:$true] %s527_s26 }
   0x9   :  { %50 = vperm.xlu0 %586, %v45_v1   ;;  %60 = vperm.xlu1 %587, %v47_v2   ;;  %v124_v4 = vld [vmem:[#allocation3 + $0x78] sm:$0xff]  ;;  %v123_v6 = vld [vmem:[#allocation3 + $0x70] sm:$0xff]  ;;  %v122_v8 = vld [vmem:[#allocation3 + $0x68] sm:$0xff]  ;;  %s525_s23 = sshll.u32 %s687_s22, 4  ;;  %s526_s23 = int_to_ptr.vmem [resolvable:$true] %s525_s23 }
   0xa   :  { %83 = vmatpush.msra.mxu0 %v82_v3  ;;  %125 = vmatpush.msra.mxu1 %v124_v4  ;;  %v79_v9 = vld [vmem:[#allocation3 + $0x260] sm:$0xff]  ;;  %v46_v11 = vld [vmem:[%s841_s1 + $0x8] sm:$0xff]  ;;  %v78_v12 = vld [vmem:[#allocation3 + $0x258] sm:$0xff] }
   0xb   :  { %v121_v10 = vld [vmem:[#allocation3 + $0x60] sm:$0xff]  ;;  %v120_v13 = vld [vmem:[#allocation3 + $0x58] sm:$0xff]  ;;  %v77_v14 = vld [vmem:[#allocation3 + $0x250] sm:$0xff] }
   0xc   :  { %84 = vmatpush.msra.mxu0 %v81_v5  ;;  %126 = vmatpush.msra.mxu1 %v123_v6  ;;  %v119_v15 = vld [vmem:[#allocation3 + $0x50] sm:$0xff]  ;;  %v76_v16 = vld [vmem:[#allocation3 + $0x248] sm:$0xff]  ;;  %v75_v18 = vld [vmem:[#allocation3 + $0x240] sm:$0xff] }
   0xd   :  { %v118_v17 = vld [vmem:[#allocation3 + $0x48] sm:$0xff]  ;;  %v117_v19 = vld [vmem:[#allocation3 + $0x40] sm:$0xff]  ;;  %v74_v20 = vld [vmem:[#allocation3 + $0x238] sm:$0xff] }
   0xe   :  { %85 = vmatpush.msra.mxu0 %v80_v7  ;;  %127 = vmatpush.msra.mxu1 %v122_v8  ;;  %v116_v21 = vld [vmem:[#allocation3 + $0x38] sm:$0xff]  ;;  %v73_v22 = vld [vmem:[#allocation3 + $0x230] sm:$0xff]  ;;  %v72_v24 = vld [vmem:[#allocation3 + $0x228] sm:$0xff] }
   0xf   :  { %v115_v23 = vld [vmem:[#allocation3 + $0x30] sm:$0xff]  ;;  %v114_v25 = vld [vmem:[#allocation3 + $0x28] sm:$0xff]  ;;  %v71_v26 = vld [vmem:[#allocation3 + $0x220] sm:$0xff] }
  0x10   :  { %86 = vmatpush.msra.mxu0 %v79_v9  ;;  %128 = vmatpush.msra.mxu1 %v121_v10  ;;  %v113_v27 = vld [vmem:[#allocation3 + $0x20] sm:$0xff]  ;;  %v70_v28 = vld [vmem:[#allocation3 + $0x218] sm:$0xff]  ;;  %v69_v30 = vld [vmem:[#allocation3 + $0x210] sm:$0xff] }
  0x11   :  { %55 = vperm.xlu0 %586, %v46_v11   ;;  %v112_v29 = vld [vmem:[#allocation3 + $0x18] sm:$0xff]  ;;  %v111_v31 = vld [vmem:[#allocation3 + $0x10] sm:$0xff]  ;;  %v68_v32 = vld [vmem:[#allocation3 + $0x208] sm:$0xff] }
  0x12   :  { %87 = vmatpush.msra.mxu0 %v78_v12  ;;  %129 = vmatpush.msra.mxu1 %v120_v13  ;;  %v110_v33 = vld [vmem:[#allocation3 + $0x8] sm:$0xff]  ;;  %v67_v34 = vld [vmem:[#allocation3 + $0x200] sm:$0xff]  ;;  %v44_v43 = vld [vmem:[%s840_s0 + $0x10] sm:$0xff] }
  0x13   :  { %v109_v35 = vld [vmem:[#allocation3] sm:$0xff]  ;;  %v43_v39 = vld [vmem:[%s840_s0 + $0x8] sm:$0xff]  ;;  %v263_v45 = vld [vmem:[#allocation3 + $0xf8] sm:$0xff] }
  0x14   :  { %88 = vmatpush.msra.mxu0 %v77_v14  ;;  %130 = vmatpush.msra.mxu1 %v119_v15  ;;  %v42_v36 = vld [vmem:[%s840_s0] sm:$0xff]  ;;  %v262_v46 = vld [vmem:[#allocation3 + $0xf0] sm:$0xff]  ;;  %v261_v47 = vld [vmem:[#allocation3 + $0xe8] sm:$0xff]  ;;  %s686_s0 = smov [#allocation6]  }
  0x15   :  { %264 = vmatpush.msra.mxu2 %v263_v45  ;;  %v260_v48 = vld [vmem:[#allocation3 + $0xe0] sm:$0xff]  ;;  %v259_v49 = vld [vmem:[#allocation3 + $0xd8] sm:$0xff]  ;;  %v258_v50 = vld [vmem:[#allocation3 + $0xd0] sm:$0xff]  ;;  %s512_s18 = sshll.u32 %s686_s0, 4  ;;  %s513_s18 = int_to_ptr.vmem [resolvable:$true] %s512_s18 }
  0x16   :  { %89 = vmatpush.msra.mxu0 %v76_v16  ;;  %131 = vmatpush.msra.mxu1 %v118_v17  ;;  %v257_v51 = vld [vmem:[#allocation3 + $0xc8] sm:$0xff]  ;;  %v256_v52 = vld [vmem:[#allocation3 + $0xc0] sm:$0xff]  ;;  %v255_v53 = vld [vmem:[#allocation3 + $0xb8] sm:$0xff] }
  0x17   :  { %265 = vmatpush.msra.mxu2 %v262_v46  ;;  %v254_v54 = vld [vmem:[#allocation3 + $0xb0] sm:$0xff]  ;;  %v253_v55 = vld [vmem:[#allocation3 + $0xa8] sm:$0xff]  ;;  %v252_v59 = vld [vmem:[#allocation3 + $0xa0] sm:$0xff] }
  0x18   :  { %90 = vmatpush.msra.mxu0 %v75_v18  ;;  %132 = vmatpush.msra.mxu1 %v117_v19  ;;  %v251_v62 = vld [vmem:[#allocation3 + $0x98] sm:$0xff]  ;;  %v250_v1 = vld [vmem:[#allocation3 + $0x90] sm:$0xff]  ;;  %v249_v4 = vld [vmem:[#allocation3 + $0x88] sm:$0xff] }
  0x19   :  { %266 = vmatpush.msra.mxu2 %v261_v47  ;;  %v248_v10 = vld [vmem:[#allocation3 + $0x80] sm:$0xff] }
  0x1a   :  { %91 = vmatpush.msra.mxu0 %v74_v20  ;;  %133 = vmatpush.msra.mxu1 %v116_v21 }
  0x1b   :  { %267 = vmatpush.msra.mxu2 %v260_v48 }
  0x1c   :  { %92 = vmatpush.msra.mxu0 %v73_v22  ;;  %134 = vmatpush.msra.mxu1 %v115_v23 }
  0x1d   :  { %268 = vmatpush.msra.mxu2 %v259_v49 }
  0x1e   :  { %93 = vmatpush.msra.mxu0 %v72_v24  ;;  %135 = vmatpush.msra.mxu1 %v114_v25 }
  0x1f   :  { %269 = vmatpush.msra.mxu2 %v258_v50 }
  0x20   :  { %94 = vmatpush.msra.mxu0 %v71_v26  ;;  %136 = vmatpush.msra.mxu1 %v113_v27 }
  0x21   :  { %270 = vmatpush.msra.mxu2 %v257_v51 }
  0x22   :  { %95 = vmatpush.msra.mxu0 %v70_v28  ;;  %137 = vmatpush.msra.mxu1 %v112_v29 }
  0x23   :  { %271 = vmatpush.msra.mxu2 %v256_v52 }
  0x24   :  { %96 = vmatpush.msra.mxu0 %v69_v30  ;;  %138 = vmatpush.msra.mxu1 %v111_v31 }
  0x25   :  { %272 = vmatpush.msra.mxu2 %v255_v53 }
  0x26   :  { %97 = vmatpush.msra.mxu0 %v68_v32  ;;  %139 = vmatpush.msra.mxu1 %v110_v33 }
  0x27   :  { %273 = vmatpush.msra.mxu2 %v254_v54 }
  0x28   :  { %98 = vmatpush.msra.mxu0 %v67_v34  ;;  %140 = vmatpush.msra.mxu1 %v109_v35 }
  0x29   :  { %274 = vmatpush.msra.mxu2 %v253_v55 }
  0x2b   :  { %275 = vmatpush.msra.mxu2 %v252_v59 }
  0x2d   :  { %276 = vmatpush.msra.mxu2 %v251_v62 }
  0x2f   :  { %277 = vmatpush.msra.mxu2 %v250_v1 }
  0x31   :  { %278 = vmatpush.msra.mxu2 %v249_v4 }
  0x33   :  { %279 = vmatpush.msra.mxu2 %v248_v10 }
  0x7b   :  { %v51_v37 = vpop.permute.xlu0 %50  ;;  %v61_v42 = vpop.permute.xlu1 %60 }
  0x7c   :  { %v63_v38 = vmul.f32 %v51_v37, %v42_v36  ;;  %v65_v44 = vmul.f32 %v61_v42, %v44_v43 }
  0x7e   :  { %99 = vmatmul.f32.vlgmr.msra.gmra.mxu0 %v63_v38  ;;  %141 = vmatmul.f32.vlgmr.msra.gmra.mxu1 %v63_v38 }
  0x83   :  { %v56_v40 = vpop.permute.xlu0 %55 }
  0x84   :  { %v64_v41 = vmul.f32 %v56_v40, %v43_v39 }
  0x86   :  { %102 = vmatmul.f32.gmra.mxu0 %v64_v41  ;;  %144 = vmatmul.f32.gmra.mxu1 %v64_v41 }
  0x8e   :  { %105 = vmatmul.f32.gmra.mxu0 %v65_v44  ;;  %147 = vmatmul.f32.gmra.mxu1 %v65_v44 }
  0xfb   :  { %v752_v56 = vpop.f32.mrf.mxu1 }
  0xfc   :  { %v151_v57 = vrot.slane %v752_v56, 4  ;;  %v169_v58 = vmul.f32 %v752_v56, %v752_v56 }
  0xfe   :  { %v152_v60 = vadd.f32 %v151_v57, %v752_v56  ;;  %v172_v61 = vrot.slane %v169_v58, 4 }
 0x100   :  { %v153_v63 = vrot.slane %v152_v60, 2  ;;  %v173_v0 = vadd.f32 %v172_v61, %v169_v58 }
 0x102   :  { %v154_v2 = vadd.f32 %v153_v63, %v152_v60  ;;  %v174_v3 = vrot.slane %v173_v0, 2 }
 0x103   :  { %v758_v5 = vpop.f32.mrf.mxu1 }
 0x104   :  { %v155_v6 = vrot.slane %v154_v2, 1  ;;  %v175_v7 = vadd.f32 %v174_v3, %v173_v0  ;;  %v157_v8 = vrot.slane %v758_v5, 4  ;;  %v170_v9 = vmul.f32 %v758_v5, %v758_v5 }
 0x106   :  { %v176_v11 = vrot.slane %v175_v7, 1  ;;  %v158_v12 = vadd.f32 %v157_v8, %v758_v5  ;;  %v178_v13 = vrot.slane %v170_v9, 4  ;;  %v156_v14 = vadd.f32 %v155_v6, %v154_v2 }
 0x108   :  { %v177_v15 = vadd.f32 %v176_v11, %v175_v7  ;;  %v159_v16 = vrot.slane %v158_v12, 2  ;;  %v179_v17 = vadd.f32 %v178_v13, %v170_v9  ;;  %v190_v18 = vmul.f32 0.125, %v156_v14 }
 0x10a   :  { %v193_v19 = vmul.f32 0.125, %v177_v15  ;;  %v160_v20 = vadd.f32 %v159_v16, %v158_v12  ;;  %v180_v21 = vrot.slane %v179_v17, 2  ;;  %v196_v22 = vmul.f32 %v190_v18, %v190_v18 }
 0x10b   :  { %v764_v23 = vpop.f32.mrf.mxu1  ;;  %v202_v63 = vsub.f32 %v752_v56, %v190_v18 }
 0x10c   :  { %v161_v24 = vrot.slane %v160_v20, 1  ;;  %v181_v25 = vadd.f32 %v180_v21, %v179_v17  ;;  %v163_v26 = vrot.slane %v764_v23, 4  ;;  %v171_v27 = vmul.f32 %v764_v23, %v764_v23 }
 0x10d   :  { %v199_v28 = vsub.f32 %v193_v19, %v196_v22 }
 0x10e   :  { %v182_v29 = vrot.slane %v181_v25, 1  ;;  %v164_v30 = vadd.f32 %v163_v26, %v764_v23  ;;  %v184_v31 = vrot.slane %v171_v27, 4  ;;  %v162_v32 = vadd.f32 %v161_v24, %v160_v20  ;;  %v402_v24 = vld [vmem:[#allocation3 + $0x178] sm:$0xff]  ;;  %v400_v26 = vld [vmem:[#allocation3 + $0x168] sm:$0xff] }
 0x10f   :  { %v205_v33 = vadd.f32 1e-05, %v199_v28  ;;  %403 = vmatpush.msra.mxu3 %v402_v24  ;;  %v398_v28 = vld [vmem:[#allocation3 + $0x158] sm:$0xff] }
 0x110   :  { %v183_v34 = vadd.f32 %v182_v29, %v181_v25  ;;  %v165_v35 = vrot.slane %v164_v30, 2  ;;  %v185_v36 = vadd.f32 %v184_v31, %v171_v27  ;;  %v191_v37 = vmul.f32 0.125, %v162_v32  ;;  %v401_v25 = vld [vmem:[#allocation3 + $0x170] sm:$0xff]  ;;  %v399_v27 = vld [vmem:[#allocation3 + $0x160] sm:$0xff]  ;;  %v394_v31 = vld [vmem:[#allocation3 + $0x138] sm:$0xff] }
 0x111   :  { %589 = vrsqrt.f32 %v205_v33  ;;  %vm214_vm1 = vweird.f32 %v205_v33  ;;  %404 = vmatpush.msra.mxu3 %v401_v25  ;;  %v397_v29 = vld [vmem:[#allocation3 + $0x150] sm:$0xff] }
 0x112   :  { %v194_v38 = vmul.f32 0.125, %v183_v34  ;;  %v166_v39 = vadd.f32 %v165_v35, %v164_v30  ;;  %v186_v40 = vrot.slane %v185_v36, 2  ;;  %v197_v41 = vmul.f32 %v191_v37, %v191_v37  ;;  %v396_v30 = vld [vmem:[#allocation3 + $0x148] sm:$0xff]  ;;  %v393_v32 = vld [vmem:[#allocation3 + $0x130] sm:$0xff] }
 0x113   :  { %v203_v10 = vsub.f32 %v758_v5, %v191_v37  ;;  %405 = vmatpush.msra.mxu3 %v400_v26  ;;  %v391_v37 = vld [vmem:[#allocation3 + $0x120] sm:$0xff] }
 0x114   :  { %v167_v42 = vrot.slane %v166_v39, 1  ;;  %v187_v43 = vadd.f32 %v186_v40, %v185_v36  ;;  %v200_v44 = vsub.f32 %v194_v38, %v197_v41  ;;  %v390_v40 = vld [vmem:[#allocation3 + $0x118] sm:$0xff] }
 0x115   :  { %406 = vmatpush.msra.mxu3 %v399_v27 }
 0x116   :  { %v188_v45 = vrot.slane %v187_v43, 1  ;;  %v206_v46 = vadd.f32 1e-05, %v200_v44  ;;  %v168_v47 = vadd.f32 %v167_v42, %v166_v39 }
 0x117   :  { %v590_v48 = vpop.eup %589  ;;  %407 = vmatpush.msra.mxu3 %v398_v28 }
 0x118   :  { %v189_v49 = vadd.f32 %v188_v45, %v187_v43  ;;  %v209_v50 = vmul.f32 %v590_v48, %v205_v33  ;;  %591 = vrsqrt.f32 %v206_v46  ;;  %v192_v51 = vmul.f32 0.125, %v168_v47  ;;  %v392_v33 = vld [vmem:[#allocation3 + $0x128] sm:$0xff]  ;;  %v389_v43 = vld [vmem:[#allocation3 + $0x110] sm:$0xff] }
 0x119   :  { %vm215_vm0 = vweird.f32 %v590_v48  ;;  %vm224_vm4 = vweird.f32 %v206_v46  ;;  %408 = vmatpush.msra.mxu3 %v397_v29 }
 0x11a   :  { %v195_v52 = vmul.f32 0.125, %v189_v49  ;;  %v210_v53 = vmul.f32 %v590_v48, %v209_v50  ;;  %v198_v54 = vmul.f32 %v192_v51, %v192_v51  ;;  %vm216_vm2 = vmor %vm214_vm1, %vm215_vm0  ;;  %v204_v19 = vsub.f32 %v764_v23, %v192_v51  ;;  %v395_v23 = vld [vmem:[#allocation3 + $0x140] sm:$0xff] }
 0x11b   :  { %409 = vmatpush.msra.mxu3 %v396_v30 }
 0x11c   :  { %v211_v55 = vmul.f32 0.5, %v210_v53  ;;  %v201_v57 = vsub.f32 %v195_v52, %v198_v54  ;;  %v387_v52 = vld [vmem:[#allocation3 + $0x100] sm:$0xff] }
 0x11d   :  { %410 = vmatpush.msra.mxu3 %v395_v23  ;;  %v445_v23 = vld [vmem:[#allocation3 + $0x1f8] sm:$0xff] }
 0x11e   :  { %v592_v58 = vpop.eup %591  ;;  %v212_v59 = vsub.f32 1.5, %v211_v55  ;;  %v207_v61 = vadd.f32 1e-05, %v201_v57  ;;  %446 = vmatpush.msrb.mxu0 %v445_v23  ;;  %547 = vmatpush.msrb.mxu1 %v445_v23 }
 0x11f   :  { %v219_v60 = vmul.f32 %v592_v58, %v206_v46  ;;  %vm225_vm3 = vweird.f32 %v592_v58  ;;  %411 = vmatpush.msra.mxu3 %v394_v31  ;;  %v388_v46 = vld [vmem:[#allocation3 + $0x108] sm:$0xff]  ;;  %v444_v31 = vld [vmem:[#allocation3 + $0x1f0] sm:$0xff]  ;;  %548 = vmatpush.msrb.mxu2 %v445_v23 }
 0x120   :  { %v213_v62 = vmul.f32 %v590_v48, %v212_v59  ;;  %593 = vrsqrt.f32 %v207_v61  ;;  %vm226_vm5 = vmor %vm224_vm4, %vm225_vm3  ;;  %vm234_vm7 = vweird.f32 %v207_v61  ;;  %447 = vmatpush.msrb.mxu0 %v444_v31  ;;  %549 = vmatpush.msrb.mxu1 %v444_v31  ;;  %vm504_vm3 = vcmask 7168  }
 0x121   :  { %v220_v0 = vmul.f32 %v592_v58, %v219_v60  ;;  %412 = vmatpush.msra.mxu3 %v393_v32  ;;  %550 = vmatpush.msrb.mxu2 %v444_v31 }
 0x122   :  { %v217_v1 = vsel %vm216_vm2, %v590_v48, %v213_v62 }
 0x123   :  { %v238_v2 = vmul.f32 %v217_v1, %v202_v63  ;;  %v221_v3 = vmul.f32 0.5, %v220_v0  ;;  %413 = vmatpush.msra.mxu3 %v392_v33 }
 0x125   :  { %v241_v4 = vmul.f32 0.01, %v238_v2  ;;  %v222_v6 = vsub.f32 1.5, %v221_v3  ;;  %414 = vmatpush.msra.mxu3 %v391_v37 }
 0x126   :  { %v594_v7 = vpop.eup %593 }
 0x127   :  { %v244_v8 = vmax.f32 %v238_v2, %v241_v4  ;;  %v223_v9 = vmul.f32 %v592_v58, %v222_v6  ;;  %v229_v11 = vmul.f32 %v594_v7, %v207_v61  ;;  %vm235_vm6 = vweird.f32 %v594_v7  ;;  %415 = vmatpush.msra.mxu3 %v390_v40 }
 0x128   :  { %vm236_vm8 = vmor %vm234_vm7, %vm235_vm6 }
 0x129   :  { %280 = vmatmul.f32.vlgmr.msra.gmra.mxu2 %v244_v8  ;;  %v227_v12 = vsel %vm226_vm5, %v592_v58, %v223_v9  ;;  %v230_v13 = vmul.f32 %v594_v7, %v229_v11  ;;  %416 = vmatpush.msra.mxu3 %v389_v43 }
 0x12a   :  { %v239_v56 = vmul.f32 %v227_v12, %v203_v10 }
 0x12b   :  { %v231_v15 = vmul.f32 0.5, %v230_v13  ;;  %417 = vmatpush.msra.mxu3 %v388_v46 }
 0x12c   :  { %v242_v14 = vmul.f32 0.01, %v239_v56 }
 0x12d   :  { %v232_v17 = vsub.f32 1.5, %v231_v15  ;;  %418 = vmatpush.msra.mxu3 %v387_v52 }
 0x12e   :  { %v245_v16 = vmax.f32 %v239_v56, %v242_v14 }
 0x12f   :  { %v233_v18 = vmul.f32 %v594_v7, %v232_v17 }
 0x131   :  { %283 = vmatmul.f32.gmra.mxu2 %v245_v16  ;;  %v237_v20 = vsel %vm236_vm8, %v594_v7, %v233_v18 }
 0x132   :  { %v240_v21 = vmul.f32 %v237_v20, %v204_v19 }
 0x134   :  { %v243_v5 = vmul.f32 0.01, %v240_v21 }
 0x136   :  { %v246_v22 = vmax.f32 %v240_v21, %v243_v5 }
 0x139   :  { %286 = vmatmul.f32.gmra.mxu2 %v246_v22 }
 0x1ac   :  { %v773_v34 = vpop.f32.mrf.mxu2 }
 0x1ad   :  { %v290_v35 = vrot.slane %v773_v34, 4  ;;  %v308_v36 = vmul.f32 %v773_v34, %v773_v34 }
 0x1af   :  { %v291_v38 = vadd.f32 %v290_v35, %v773_v34  ;;  %v311_v39 = vrot.slane %v308_v36, 4 }
 0x1b1   :  { %v292_v41 = vrot.slane %v291_v38, 2  ;;  %v312_v42 = vadd.f32 %v311_v39, %v308_v36  ;;  %v443_v36 = vld [vmem:[#allocation3 + $0x1e8] sm:$0xff]  ;;  %v442_v39 = vld [vmem:[#allocation3 + $0x1e0] sm:$0xff] }
 0x1b2   :  { %448 = vmatpush.msrb.mxu0 %v443_v36  ;;  %551 = vmatpush.msrb.mxu1 %v443_v36 }
 0x1b3   :  { %v293_v44 = vadd.f32 %v292_v41, %v291_v38  ;;  %v313_v45 = vrot.slane %v312_v42, 2  ;;  %552 = vmatpush.msrb.mxu2 %v443_v36 }
 0x1b4   :  { %v779_v47 = vpop.f32.mrf.mxu2  ;;  %449 = vmatpush.msrb.mxu0 %v442_v39  ;;  %553 = vmatpush.msrb.mxu1 %v442_v39 }
 0x1b5   :  { %v294_v48 = vrot.slane %v293_v44, 1  ;;  %v314_v49 = vadd.f32 %v313_v45, %v312_v42  ;;  %v296_v50 = vrot.slane %v779_v47, 4  ;;  %v309_v51 = vmul.f32 %v779_v47, %v779_v47  ;;  %554 = vmatpush.msrb.mxu2 %v442_v39 }
 0x1b7   :  { %v315_v53 = vrot.slane %v314_v49, 1  ;;  %v297_v54 = vadd.f32 %v296_v50, %v779_v47  ;;  %v317_v55 = vrot.slane %v309_v51, 4  ;;  %v295_v57 = vadd.f32 %v294_v48, %v293_v44  ;;  %v441_v44 = vld [vmem:[#allocation3 + $0x1d8] sm:$0xff] }
 0x1b8   :  { %450 = vmatpush.msrb.mxu0 %v441_v44  ;;  %555 = vmatpush.msrb.mxu1 %v441_v44 }
 0x1b9   :  { %v316_v58 = vadd.f32 %v315_v53, %v314_v49  ;;  %v298_v59 = vrot.slane %v297_v54, 2  ;;  %v318_v60 = vadd.f32 %v317_v55, %v309_v51  ;;  %v785_v61 = vmul.f32 0.125, %v295_v57  ;;  %v440_v49 = vld [vmem:[#allocation3 + $0x1d0] sm:$0xff]  ;;  %v439_v53 = vld [vmem:[#allocation3 + $0x1c8] sm:$0xff]  ;;  %556 = vmatpush.msrb.mxu2 %v441_v44  ;;  %v438_v57 = vld [vmem:[#allocation3 + $0x1c0] sm:$0xff] }
 0x1ba   :  { %451 = vmatpush.msrb.mxu0 %v440_v49  ;;  %557 = vmatpush.msrb.mxu1 %v440_v49 }
 0x1bb   :  { %v332_v62 = vmul.f32 0.125, %v316_v58  ;;  %v299_v63 = vadd.f32 %v298_v59, %v297_v54  ;;  %v319_v0 = vrot.slane %v318_v60, 2  ;;  %v335_v1 = vmul.f32 %v785_v61, %v785_v61  ;;  %558 = vmatpush.msrb.mxu2 %v440_v49 }
 0x1bc   :  { %v789_v2 = vpop.f32.mrf.mxu2  ;;  %v341_v46 = vsub.f32 %v773_v34, %v785_v61  ;;  %452 = vmatpush.msrb.mxu0 %v439_v53  ;;  %559 = vmatpush.msrb.mxu1 %v439_v53 }
 0x1bd   :  { %v300_v3 = vrot.slane %v299_v63, 1  ;;  %v320_v4 = vadd.f32 %v319_v0, %v318_v60  ;;  %v302_v6 = vrot.slane %v789_v2, 4  ;;  %v310_v7 = vmul.f32 %v789_v2, %v789_v2  ;;  %v437_v60 = vld [vmem:[#allocation3 + $0x1b8] sm:$0xff]  ;;  %560 = vmatpush.msrb.mxu2 %v439_v53  ;;  %v436_v0 = vld [vmem:[#allocation3 + $0x1b0] sm:$0xff] }
 0x1be   :  { %v338_v8 = vsub.f32 %v332_v62, %v335_v1  ;;  %453 = vmatpush.msrb.mxu0 %v438_v57  ;;  %561 = vmatpush.msrb.mxu1 %v438_v57 }
 0x1bf   :  { %v321_v9 = vrot.slane %v320_v4, 1  ;;  %v303_v10 = vadd.f32 %v302_v6, %v789_v2  ;;  %v323_v11 = vrot.slane %v310_v7, 4  ;;  %v301_v12 = vadd.f32 %v300_v3, %v299_v63  ;;  %562 = vmatpush.msrb.mxu2 %v438_v57 }
 0x1c0   :  { %v344_v56 = vadd.f32 1e-05, %v338_v8  ;;  %454 = vmatpush.msrb.mxu0 %v437_v60  ;;  %563 = vmatpush.msrb.mxu1 %v437_v60 }
 0x1c1   :  { %v322_v13 = vadd.f32 %v321_v9, %v320_v4  ;;  %v304_v14 = vrot.slane %v303_v10, 2  ;;  %v324_v15 = vadd.f32 %v323_v11, %v310_v7  ;;  %v795_v16 = vmul.f32 0.125, %v301_v12  ;;  %v435_v4 = vld [vmem:[#allocation3 + $0x1a8] sm:$0xff]  ;;  %564 = vmatpush.msrb.mxu2 %v437_v60 }
 0x1c2   :  { %595 = vrsqrt.f32 %v344_v56  ;;  %vm353_vm10 = vweird.f32 %v344_v56  ;;  %455 = vmatpush.msrb.mxu0 %v436_v0  ;;  %565 = vmatpush.msrb.mxu1 %v436_v0 }
 0x1c3   :  { %v333_v17 = vmul.f32 0.125, %v322_v13  ;;  %v305_v18 = vadd.f32 %v304_v14, %v303_v10  ;;  %v325_v19 = vrot.slane %v324_v15, 2  ;;  %v336_v20 = vmul.f32 %v795_v16, %v795_v16  ;;  %566 = vmatpush.msrb.mxu2 %v436_v0  ;;  %v433_v10 = vld [vmem:[#allocation3 + $0x198] sm:$0xff] }
 0x1c4   :  { %v342_v61 = vsub.f32 %v779_v47, %v795_v16  ;;  %v434_v47 = vld [vmem:[#allocation3 + $0x1a0] sm:$0xff]  ;;  %456 = vmatpush.msrb.mxu0 %v435_v4  ;;  %567 = vmatpush.msrb.mxu1 %v435_v4 }
 0x1c5   :  { %v306_v21 = vrot.slane %v305_v18, 1  ;;  %v326_v5 = vadd.f32 %v325_v19, %v324_v15  ;;  %v339_v22 = vsub.f32 %v333_v17, %v336_v20  ;;  %568 = vmatpush.msrb.mxu2 %v435_v4  ;;  %v431_v15 = vld [vmem:[#allocation3 + $0x188] sm:$0xff] }
 0x1c6   :  { %457 = vmatpush.msrb.mxu0 %v434_v47  ;;  %569 = vmatpush.msrb.mxu1 %v434_v47 }
 0x1c7   :  { %v327_v24 = vrot.slane %v326_v5, 1  ;;  %v799_v25 = vadd.f32 1e-05, %v339_v22  ;;  %v307_v26 = vadd.f32 %v306_v21, %v305_v18  ;;  %570 = vmatpush.msrb.mxu2 %v434_v47  ;;  %v430_v18 = vld [vmem:[#allocation3 + $0x180] sm:$0xff]  ;;  %v100_v21 = vpop.f32.mrf.mxu0 }
 0x1c8   :  { %v596_v27 = vpop.eup %595  ;;  %458 = vmatpush.msrb.mxu0 %v433_v10  ;;  %571 = vmatpush.msrb.mxu1 %v433_v10 }
 0x1c9   :  { %v328_v28 = vadd.f32 %v327_v24, %v326_v5  ;;  %v348_v29 = vmul.f32 %v596_v27, %v344_v56  ;;  %597 = vrsqrt.f32 %v799_v25  ;;  %v802_v30 = vmul.f32 0.125, %v307_v26  ;;  %v432_v56 = vld [vmem:[#allocation3 + $0x190] sm:$0xff]  ;;  %572 = vmatpush.msrb.mxu2 %v433_v10 }
 0x1ca   :  { %vm354_vm9 = vweird.f32 %v596_v27  ;;  %vm363_vm13 = vweird.f32 %v799_v25  ;;  %459 = vmatpush.msrb.mxu0 %v432_v56  ;;  %573 = vmatpush.msrb.mxu1 %v432_v56  ;;  %v685_v26 = vmov 3.0  }
 0x1cb   :  { %v334_v32 = vmul.f32 0.125, %v328_v28  ;;  %v349_v33 = vmul.f32 %v596_v27, %v348_v29  ;;  %v337_v35 = vmul.f32 %v802_v30, %v802_v30  ;;  %vm355_vm11 = vmor %vm353_vm10, %vm354_vm9  ;;  %v343_v12 = vsub.f32 %v789_v2, %v802_v30  ;;  %574 = vmatpush.msrb.mxu2 %v432_v56 }
 0x1cc   :  { %460 = vmatpush.msrb.mxu0 %v431_v15  ;;  %575 = vmatpush.msrb.mxu1 %v431_v15 }
 0x1cd   :  { %v350_v37 = vmul.f32 0.5, %v349_v33  ;;  %v340_v38 = vsub.f32 %v334_v32, %v337_v35  ;;  %576 = vmatpush.msrb.mxu2 %v431_v15 }
 0x1ce   :  { %461 = vmatpush.msrb.mxu0 %v430_v18  ;;  %577 = vmatpush.msrb.mxu1 %v430_v18 }
 0x1cf   :  { %v598_v40 = vpop.eup %597  ;;  %v351_v41 = vsub.f32 1.5, %v350_v37  ;;  %v807_v43 = vadd.f32 1e-05, %v340_v38  ;;  %578 = vmatpush.msrb.mxu2 %v430_v18  ;;  %v103_v5 = vpop.f32.mrf.mxu0 }
 0x1d0   :  { %v358_v42 = vmul.f32 %v598_v40, %v799_v25  ;;  %vm364_vm12 = vweird.f32 %v598_v40 }
 0x1d1   :  { %v352_v45 = vmul.f32 %v596_v27, %v351_v41  ;;  %599 = vrsqrt.f32 %v807_v43  ;;  %vm365_vm14 = vmor %vm363_vm13, %vm364_vm12  ;;  %vm373_vm0 = vweird.f32 %v807_v43 }
 0x1d2   :  { %v359_v48 = vmul.f32 %v598_v40, %v358_v42  ;;  %601 = vrcp.f32 %v685_v26  ;;  %v588_v42 = vld [vmem:[%s843_s3] ss:$0 sm:$0xff] }
 0x1d3   :  { %v356_v50 = vsel %vm355_vm11, %v596_v27, %v352_v45  ;;  %v502_v45 = vstv %s844_s4 }
 0x1d4   :  { %v377_v51 = vmul.f32 %v356_v50, %v341_v46  ;;  %v360_v52 = vmul.f32 0.5, %v359_v48 }
 0x1d6   :  { %v380_v54 = vmul.f32 0.01, %v377_v51  ;;  %v361_v55 = vsub.f32 1.5, %v360_v52 }
 0x1d7   :  { %v600_v34 = vpop.eup %599  ;;  %v106_v22 = vpop.f32.mrf.mxu0 }
 0x1d8   :  { %v383_v58 = vmax.f32 %v377_v51, %v380_v54  ;;  %v362_v59 = vmul.f32 %v598_v40, %v361_v55  ;;  %v368_v62 = vmul.f32 %v600_v34, %v807_v43  ;;  %vm374_vm15 = vweird.f32 %v600_v34  ;;  %v602_v28 = vpop.eup %601 }
 0x1d9   :  { %vm375_vm1 = vmor %vm373_vm0, %vm374_vm15  ;;  %v487_v23 = vmul.f32 3.0, %v602_v28  ;;  %vm491_vm2 = vweird.f32 %v602_v28 }
 0x1da   :  { %419 = vmatmul.f32.vlgmr.msra.gmra.mxu3 %v383_v58  ;;  %v366_v63 = vsel %vm365_vm14, %v598_v40, %v362_v59  ;;  %v369_v3 = vmul.f32 %v600_v34, %v368_v62 }
 0x1db   :  { %v378_v1 = vmul.f32 %v366_v63, %v342_v61  ;;  %v488_v32 = vsub.f32 1.0, %v487_v23 }
 0x1dc   :  { %v370_v7 = vmul.f32 0.5, %v369_v3 }
 0x1dd   :  { %v381_v6 = vmul.f32 0.01, %v378_v1  ;;  %v489_v33 = vmul.f32 %v602_v28, %v488_v32 }
 0x1de   :  { %v371_v9 = vsub.f32 1.5, %v370_v7 }
 0x1df   :  { %v384_v8 = vmax.f32 %v378_v1, %v381_v6  ;;  %v490_v36 = vadd.f32 %v602_v28, %v489_v33 }
 0x1e0   :  { %v372_v11 = vmul.f32 %v600_v34, %v371_v9 }
 0x1e1   :  { %v492_v40 = vsel %vm491_vm2, %v602_v28, %v490_v36 }
 0x1e2   :  { %422 = vmatmul.f32.gmra.mxu3 %v384_v8  ;;  %v376_v13 = vsel %vm375_vm1, %v600_v34, %v372_v11 }
 0x1e3   :  { %v379_v14 = vmul.f32 %v376_v13, %v343_v12 }
 0x1e5   :  { %v382_v16 = vmul.f32 0.01, %v379_v14 }
 0x1e7   :  { %v385_v17 = vmax.f32 %v379_v14, %v382_v16 }
 0x1ea   :  { %425 = vmatmul.f32.gmra.mxu3 %v385_v17 }
 0x25d   :  { %v420_v2 = vpop.f32.mrf.mxu3 }
 0x25e   :  { %478 = vst [vmem:[#allocation6] sm:$0xff] %v420_v2  ;;  %462 = vmatmul.f32.vlgmr.msrb.gmra.mxu0 %v420_v2 }
 0x265   :  { %v423_v19 = vpop.f32.mrf.mxu3 }
 0x266   :  { %479 = vst [vmem:[#allocation6 + $0x8] sm:$0xff] %v423_v19  ;;  %465 = vmatmul.f32.vlgmr.msrb.gmra.mxu1 %v423_v19 }
 0x26d   :  { %v426_v20 = vpop.f32.mrf.mxu3 }
 0x26e   :  { %480 = vst [vmem:[#allocation6 + $0x10] sm:$0xff] %v426_v20  ;;  %468 = vmatmul.f32.vlgmr.msrb.gmra.mxu2 %v426_v20 }
 0x26f   :  { %520 = dma.vmem_to_hbm [thread:$0]  %s513_s18, 384, %s515_s21, [#allocation5], %s682_s29, %s682_s29, %s683_s30  }
 0x2db   :  { %v463_v24 = vpop.f32.mrf.mxu0 }
 0x2dc   :  { %v472_v25 = vadd.f32 %v463_v24, %v420_v2 }
 0x2de   :  { %v475_v27 = vadd.f32 %v472_v25, %v100_v21 }
 0x2e0   :  { %481 = vst [vmem:[#allocation7] sm:$0xff] %v475_v27 }
 0x2e3   :  { %v466_v29 = vpop.f32.mrf.mxu1 }
 0x2e4   :  { %v473_v30 = vadd.f32 %v466_v29, %v423_v19 }
 0x2e6   :  { %v476_v31 = vadd.f32 %v473_v30, %v103_v5 }
 0x2e8   :  { %482 = vst [vmem:[#allocation7 + $0x8] sm:$0xff] %v476_v31  ;;  %v484_v38 = vadd.f32 %v476_v31, %v475_v27 }
 0x2f1   :  { %v469_v35 = vpop.f32.mrf.mxu2 }
 0x2f2   :  { %v474_v37 = vadd.f32 %v469_v35, %v426_v20 }
 0x2f4   :  { %v477_v39 = vadd.f32 %v474_v37, %v106_v22 }
 0x2f6   :  { %483 = vst [vmem:[#allocation7 + $0x10] sm:$0xff] %v477_v39  ;;  %v485_v41 = vadd.f32 %v484_v38, %v477_v39 }
 0x2f7   :  { %533 = dma.vmem_to_hbm [thread:$0]  %s526_s23, 384, %s528_s26, [#allocation8], %s682_s29, %s682_s29, %s683_s30  }
 0x2f8   :  { %v493_v43 = vmul.f32 %v492_v40, %v485_v41 }
 0x2fa   :  { %v498_v44 = vmul.f32 %v588_v42, %v493_v43 }
 0x2fc   :  { %499 = vadd.xlane.f32.xlu1 %v498_v44 }
 0x36f   :  { %v500_v46 = vpop.xlane.xlu1 %499 }
 0x370   :  { %v503_v48 = vadd.f32 %v502_v45, %v500_v46 }
 0x372   :  { %505 = vst.msk [vmem:[%s845_s5] sm:$0xff] %vm504_vm3, %v503_v48 }
 0x373   :  { %677 = dma.done.wait [#allocation5], 384  }
 0x374   :  { %678 = vsyncadd [#allocation5], 4294966912 }
 0x375   :  { %679 = dma.done.wait [#allocation8], 384  }
 0x376   :  { %680 = vsyncadd [#allocation8], 4294966912 }
 0x377   :  { %544 = vsyncpa [#allocation4], 1 }
 0x378   :  { %545 = vsyncpa [#allocation5], 1 }
 0x379   :  { %546 = vsyncpa [#allocation8], 1 }

</bundles_post_ra>
